<compile_context>
chip_gen: v6e
topology: v6e:2x2x1
jax: 0.10.0
libtpu: 0.0.40
codegen_flags: <defaults>
</compile_context>

<pallas_src>
import functools

import jax
import jax.numpy as jnp
from jax.experimental import pallas as pl
from jax.experimental.pallas import tpu as pltpu

_LANE = 128
_SUB = 8


def _focal_ce_kernel(preds_ref, labels_ref, nll_ref, cnt_ref, *, num_classes,
                     ignore_index):
    """Accumulates per-sample sum(-log p_target) and valid-pixel count.

    preds_ref : (1, C, tile_r, 128)  logits (any float dtype, upcast in VMEM)
    labels_ref: (1, tile_r, 128)     int32 labels (ignore_index marks invalid)
    nll_ref   : (1, 8, 128) f32      lane-shaped partial sums of -log p_target
    cnt_ref   : (1, 8, 128) f32      lane-shaped partial counts of valid pixels
    """
    s = pl.program_id(1)

    @pl.when(s == 0)
    def _():
        nll_ref[...] = jnp.zeros_like(nll_ref)
        cnt_ref[...] = jnp.zeros_like(cnt_ref)

    lab = labels_ref[0]                                    # (tile_r, 128) int32

    # Channel max: VPU maximum across C vreg sets (C is a leading block dim).
    m = preds_ref[0, 0].astype(jnp.float32)
    for ch in range(1, num_classes):
        m = jnp.maximum(m, preds_ref[0, ch].astype(jnp.float32))

    # Sum of exp + "gather" of the target-class logit via per-channel select.
    sum_exp = jnp.zeros_like(m)
    tgt = jnp.zeros_like(m)
    for ch in range(num_classes):
        xc = preds_ref[0, ch].astype(jnp.float32)
        sum_exp = sum_exp + jnp.exp(xc - m)
        tgt = tgt + jnp.where(lab == ch, xc, 0.0)

    valid = lab != ignore_index
    # -log softmax(x)[target] = (max + log sum exp) - x[target]; 0 on ignored pixels.
    nll = jnp.where(valid, (m + jnp.log(sum_exp)) - tgt, 0.0)
    cnt = valid.astype(jnp.float32)

    tile_r = nll.shape[0]
    # Fold (tile_r, 128) -> (8, 128): sublane-split reshape is layout-free, the
    # reduction over the leading axis is plain VPU adds across vreg sets.
    nll_ref[0] += jnp.sum(nll.reshape(tile_r // _SUB, _SUB, _LANE), axis=0)
    cnt_ref[0] += jnp.sum(cnt.reshape(tile_r // _SUB, _SUB, _LANE), axis=0)


def focal_loss(preds, labels, *, alpha=0.5, gamma=2.0, ignore_index=255):
    """Pallas implementation of FocalLoss.forward (weight=None, as in the module)."""
    # TODO(synk): per-class CrossEntropyLoss `weight` vector is not implemented
    # (the module's default is weight=None, which this matches).
    n, c, h, w = preds.shape
    assert labels.shape == (n, h, w)
    labels = labels.astype(jnp.int32)

    s_total = h * w
    r = pl.cdiv(s_total, _LANE)                 # rows of 128 lanes per sample

    # Spatial tile over the sublane axis: target ~1 MiB of logits per block,
    # capped at 256 rows (32K pixels), multiple of 8 sublanes.
    itemsize = jnp.dtype(preds.dtype).itemsize
    tile_r = max(_SUB, min(256, (1 << 20) // max(1, c * _LANE * itemsize)))
    tile_r = max(_SUB, (tile_r // _SUB) * _SUB)
    if r <= tile_r:
        tile_r = max(_SUB, ((r + _SUB - 1) // _SUB) * _SUB)
    r_pad = pl.cdiv(r, tile_r) * tile_r
    s_pad = r_pad * _LANE

    # Free contiguous reshapes; padding only materializes when spatial is ragged.
    preds_f = preds.reshape(n, c, s_total)
    labels_f = labels.reshape(n, s_total)
    if s_pad != s_total:
        # Padded pixels get label=ignore_index -> contribute 0 to both sums.
        # TODO(synk): replace the tail pad with an in-kernel row mask to avoid the copy.
        preds_f = jnp.pad(preds_f, ((0, 0), (0, 0), (0, s_pad - s_total)))
        labels_f = jnp.pad(labels_f, ((0, 0), (0, s_pad - s_total)),
                           constant_values=ignore_index)
    preds_b = preds_f.reshape(n, c, r_pad, _LANE)
    labels_b = labels_f.reshape(n, r_pad, _LANE)

    kernel = functools.partial(_focal_ce_kernel, num_classes=c,
                               ignore_index=ignore_index)

    # Explicit VMEM budget: double-buffered inputs + outputs + slack (<= 64 MiB,
    # safe on v5e/v6e/v7x; our blocks are tiny relative to every generation).
    block_bytes = c * tile_r * _LANE * itemsize + tile_r * _LANE * 4
    vmem_limit = min(64 * 1024 * 1024,
                     max(16 * 1024 * 1024, 2 * block_bytes + (1 << 20)))

    nll_part, cnt_part = pl.pallas_call(
        kernel,
        out_shape=(
            jax.ShapeDtypeStruct((n, _SUB, _LANE), jnp.float32),
            jax.ShapeDtypeStruct((n, _SUB, _LANE), jnp.float32),
        ),
        grid_spec=pltpu.PrefetchScalarGridSpec(
            num_scalar_prefetch=0,
            grid=(n, r_pad // tile_r),
            in_specs=[
                pl.BlockSpec((1, c, tile_r, _LANE), lambda b, s: (b, 0, s, 0)),
                pl.BlockSpec((1, tile_r, _LANE), lambda b, s: (b, s, 0)),
            ],
            out_specs=[
                pl.BlockSpec((1, _SUB, _LANE), lambda b, s: (b, 0, 0)),
                pl.BlockSpec((1, _SUB, _LANE), lambda b, s: (b, 0, 0)),
            ],
        ),
        compiler_params=pltpu.CompilerParams(
            dimension_semantics=("parallel", "arbitrary"),
            vmem_limit_bytes=vmem_limit,
        ),
    )(preds_b, labels_b)

    # Final tiny reductions + focal transform on (N,)-sized data in the wrapper.
    nll_sum = jnp.sum(nll_part, axis=(1, 2))        # per-sample sum of -log p_target
    valid_cnt = jnp.sum(cnt_part, axis=(1, 2))      # per-sample # of valid pixels

    ce = nll_sum / valid_cnt         # NaN if a sample has no valid pixel (matches torch)
    logpt = -ce
    pt = jnp.exp(logpt)
    per_sample = -((1.0 - pt) ** gamma) * alpha * logpt
    return jnp.sum(per_sample)       # loss.mean() of the 1-element accumulator == sum


def _reference(preds, labels, alpha, gamma, ignore_index):
    """Pure-JAX reference matching the PyTorch FocalLoss module."""
    logp = jax.nn.log_softmax(preds.astype(jnp.float32), axis=1)     # (N, C, H, W)
    valid = labels != ignore_index
    lab_safe = jnp.where(valid, labels, 0)
    logp_t = jnp.take_along_axis(logp, lab_safe[:, None, :, :], axis=1)[:, 0]
    nll = jnp.where(valid, -logp_t, 0.0)
    ce = nll.sum(axis=(1, 2)) / valid.sum(axis=(1, 2))
    logpt = -ce
    pt = jnp.exp(logpt)
    return jnp.sum(-((1.0 - pt) ** gamma) * alpha * logpt)


if __name__ == "__main__":
    key = jax.random.PRNGKey(0)
    k1, k2, k3 = jax.random.split(key, 3)

    n, c, h, w = 2, 4, 16, 16
    preds = jax.random.normal(k1, (n, c, h, w), dtype=jnp.float32)
    labels = jax.random.randint(k2, (n, h, w), 0, c, dtype=jnp.int32)
    # Sprinkle some ignored pixels (ignore_index=255) to exercise masking.
    labels = jnp.where(jax.random.uniform(k3, (n, h, w)) < 0.1, 255, labels)

    loss_fn = jax.jit(focal_loss)
    loss = jax.block_until_ready(loss_fn(preds, labels))

    ref = jax.block_until_ready(_reference(preds, labels, 0.5, 2.0, 255))
    assert jnp.allclose(loss, ref, rtol=1e-5, atol=1e-6), (loss, ref)

    print("KERNEL_OK")
</pallas_src>

<mosaic_0001>
module attributes {stable_mosaic.version = 11 : i64} {
  func.func @_focal_ce_kernel(%arg0: i32, %arg1: i32, %arg2: memref<1x4x8x128xf32, #tpu.memory_space<vmem>>, %arg3: memref<1x8x128xi32, #tpu.memory_space<vmem>>, %arg4: memref<1x8x128xf32, #tpu.memory_space<vmem>>, %arg5: memref<1x8x128xf32, #tpu.memory_space<vmem>>) attributes {dimension_semantics = [#tpu.dimension_semantics<parallel>, #tpu.dimension_semantics<arbitrary>], iteration_bounds = array<i64: 2, 1>, scalar_prefetch = 0 : i64, scratch_operands = 0 : i64, tpu.core_type = #tpu.core_type<tc>, window_params = [{transform_indices = @transform_0, window_bounds = array<i64: 1, 4, 8, 128>}, {transform_indices = @transform_1, window_bounds = array<i64: 1, 8, 128>}, {transform_indices = @transform_2, window_bounds = array<i64: 1, 8, 128>}, {transform_indices = @transform_3, window_bounds = array<i64: 1, 8, 128>}]} {
    %c0_i32 = arith.constant 0 : i32
    %0 = arith.cmpi eq, %arg1, %c0_i32 : i32
    %1 = arith.extui %0 : i1 to i32
    %c0_i32_0 = arith.constant 0 : i32
    %2 = arith.cmpi ne, %1, %c0_i32_0 : i32
    scf.if %2 {
      %cst_53 = arith.constant 0.000000e+00 : f32
      %83 = vector.broadcast %cst_53 : f32 to vector<1x8x128xf32>
      %c0_54 = arith.constant 0 : index
      %c0_55 = arith.constant 0 : index
      %c0_56 = arith.constant 0 : index
      %84 = vector.load %arg4[%c0_54, %c0_55, %c0_56] : memref<1x8x128xf32, #tpu.memory_space<vmem>>, vector<1x8x128xf32>
      tpu.vector_store %arg4[%c0_54, %c0_55, %c0_56], %83 {strides = array<i32>} : memref<1x8x128xf32, #tpu.memory_space<vmem>>, vector<1x8x128xf32>,
      %cst_57 = arith.constant 0.000000e+00 : f32
      %85 = vector.broadcast %cst_57 : f32 to vector<1x8x128xf32>
      %c0_58 = arith.constant 0 : index
      %c0_59 = arith.constant 0 : index
      %c0_60 = arith.constant 0 : index
      %86 = vector.load %arg5[%c0_58, %c0_59, %c0_60] : memref<1x8x128xf32, #tpu.memory_space<vmem>>, vector<1x8x128xf32>
      tpu.vector_store %arg5[%c0_58, %c0_59, %c0_60], %85 {strides = array<i32>} : memref<1x8x128xf32, #tpu.memory_space<vmem>>, vector<1x8x128xf32>,
    } else {
    }
    %c0 = arith.constant 0 : index
    %c0_1 = arith.constant 0 : index
    %c0_2 = arith.constant 0 : index
    %3 = vector.load %arg3[%c0, %c0_1, %c0_2] : memref<1x8x128xi32, #tpu.memory_space<vmem>>, vector<1x8x128xi32>
    %4 = vector.shape_cast %3 : vector<1x8x128xi32> to vector<8x128xi32>
    %c0_3 = arith.constant 0 : index
    %c0_4 = arith.constant 0 : index
    %c0_5 = arith.constant 0 : index
    %c0_6 = arith.constant 0 : index
    %5 = vector.load %arg2[%c0_3, %c0_4, %c0_5, %c0_6] : memref<1x4x8x128xf32, #tpu.memory_space<vmem>>, vector<1x1x8x128xf32>
    %6 = vector.shape_cast %5 : vector<1x1x8x128xf32> to vector<8x128xf32>
    %c0_7 = arith.constant 0 : index
    %c1 = arith.constant 1 : index
    %c0_8 = arith.constant 0 : index
    %c0_9 = arith.constant 0 : index
    %7 = vector.load %arg2[%c0_7, %c1, %c0_8, %c0_9] : memref<1x4x8x128xf32, #tpu.memory_space<vmem>>, vector<1x1x8x128xf32>
    %8 = vector.shape_cast %7 : vector<1x1x8x128xf32> to vector<8x128xf32>
    %9 = arith.maximumf %6, %8 : vector<8x128xf32>
    %c0_10 = arith.constant 0 : index
    %c2 = arith.constant 2 : index
    %c0_11 = arith.constant 0 : index
    %c0_12 = arith.constant 0 : index
    %10 = vector.load %arg2[%c0_10, %c2, %c0_11, %c0_12] : memref<1x4x8x128xf32, #tpu.memory_space<vmem>>, vector<1x1x8x128xf32>
    %11 = vector.shape_cast %10 : vector<1x1x8x128xf32> to vector<8x128xf32>
    %12 = arith.maximumf %9, %11 : vector<8x128xf32>
    %c0_13 = arith.constant 0 : index
    %c3 = arith.constant 3 : index
    %c0_14 = arith.constant 0 : index
    %c0_15 = arith.constant 0 : index
    %13 = vector.load %arg2[%c0_13, %c3, %c0_14, %c0_15] : memref<1x4x8x128xf32, #tpu.memory_space<vmem>>, vector<1x1x8x128xf32>
    %14 = vector.shape_cast %13 : vector<1x1x8x128xf32> to vector<8x128xf32>
    %15 = arith.maximumf %12, %14 : vector<8x128xf32>
    %cst = arith.constant 0.000000e+00 : f32
    %16 = vector.broadcast %cst : f32 to vector<8x128xf32>
    %cst_16 = arith.constant 0.000000e+00 : f32
    %17 = vector.broadcast %cst_16 : f32 to vector<8x128xf32>
    %c0_17 = arith.constant 0 : index
    %c0_18 = arith.constant 0 : index
    %c0_19 = arith.constant 0 : index
    %c0_20 = arith.constant 0 : index
    %18 = vector.load %arg2[%c0_17, %c0_18, %c0_19, %c0_20] : memref<1x4x8x128xf32, #tpu.memory_space<vmem>>, vector<1x1x8x128xf32>
    %19 = vector.shape_cast %18 : vector<1x1x8x128xf32> to vector<8x128xf32>
    %20 = arith.subf %19, %15 : vector<8x128xf32>
    %21 = math.exp %20 : vector<8x128xf32>
    %22 = arith.addf %16, %21 : vector<8x128xf32>
    %c0_i32_21 = arith.constant 0 : i32
    %23 = vector.broadcast %c0_i32_21 : i32 to vector<8x128xi32>
    %24 = arith.cmpi eq, %4, %23 : vector<8x128xi32>
    %cst_22 = arith.constant 0.000000e+00 : f32
    %25 = vector.broadcast %cst_22 : f32 to vector<8x128xf32>
    %26 = arith.select %24, %19, %25 : vector<8x128xi1>, vector<8x128xf32>
    %27 = arith.addf %17, %26 : vector<8x128xf32>
    %c0_23 = arith.constant 0 : index
    %c1_24 = arith.constant 1 : index
    %c0_25 = arith.constant 0 : index
    %c0_26 = arith.constant 0 : index
    %28 = vector.load %arg2[%c0_23, %c1_24, %c0_25, %c0_26] : memref<1x4x8x128xf32, #tpu.memory_space<vmem>>, vector<1x1x8x128xf32>
    %29 = vector.shape_cast %28 : vector<1x1x8x128xf32> to vector<8x128xf32>
    %30 = arith.subf %29, %15 : vector<8x128xf32>
    %31 = math.exp %30 : vector<8x128xf32>
    %32 = arith.addf %22, %31 : vector<8x128xf32>
    %c1_i32 = arith.constant 1 : i32
    %33 = vector.broadcast %c1_i32 : i32 to vector<8x128xi32>
    %34 = arith.cmpi eq, %4, %33 : vector<8x128xi32>
    %cst_27 = arith.constant 0.000000e+00 : f32
    %35 = vector.broadcast %cst_27 : f32 to vector<8x128xf32>
    %36 = arith.select %34, %29, %35 : vector<8x128xi1>, vector<8x128xf32>
    %37 = arith.addf %27, %36 : vector<8x128xf32>
    %c0_28 = arith.constant 0 : index
    %c2_29 = arith.constant 2 : index
    %c0_30 = arith.constant 0 : index
    %c0_31 = arith.constant 0 : index
    %38 = vector.load %arg2[%c0_28, %c2_29, %c0_30, %c0_31] : memref<1x4x8x128xf32, #tpu.memory_space<vmem>>, vector<1x1x8x128xf32>
    %39 = vector.shape_cast %38 : vector<1x1x8x128xf32> to vector<8x128xf32>
    %40 = arith.subf %39, %15 : vector<8x128xf32>
    %41 = math.exp %40 : vector<8x128xf32>
    %42 = arith.addf %32, %41 : vector<8x128xf32>
    %c2_i32 = arith.constant 2 : i32
    %43 = vector.broadcast %c2_i32 : i32 to vector<8x128xi32>
    %44 = arith.cmpi eq, %4, %43 : vector<8x128xi32>
    %cst_32 = arith.constant 0.000000e+00 : f32
    %45 = vector.broadcast %cst_32 : f32 to vector<8x128xf32>
    %46 = arith.select %44, %39, %45 : vector<8x128xi1>, vector<8x128xf32>
    %47 = arith.addf %37, %46 : vector<8x128xf32>
    %c0_33 = arith.constant 0 : index
    %c3_34 = arith.constant 3 : index
    %c0_35 = arith.constant 0 : index
    %c0_36 = arith.constant 0 : index
    %48 = vector.load %arg2[%c0_33, %c3_34, %c0_35, %c0_36] : memref<1x4x8x128xf32, #tpu.memory_space<vmem>>, vector<1x1x8x128xf32>
    %49 = vector.shape_cast %48 : vector<1x1x8x128xf32> to vector<8x128xf32>
    %50 = arith.subf %49, %15 : vector<8x128xf32>
    %51 = math.exp %50 : vector<8x128xf32>
    %52 = arith.addf %42, %51 : vector<8x128xf32>
    %c3_i32 = arith.constant 3 : i32
    %53 = vector.broadcast %c3_i32 : i32 to vector<8x128xi32>
    %54 = arith.cmpi eq, %4, %53 : vector<8x128xi32>
    %cst_37 = arith.constant 0.000000e+00 : f32
    %55 = vector.broadcast %cst_37 : f32 to vector<8x128xf32>
    %56 = arith.select %54, %49, %55 : vector<8x128xi1>, vector<8x128xf32>
    %57 = arith.addf %47, %56 : vector<8x128xf32>
    %c255_i32 = arith.constant 255 : i32
    %58 = vector.broadcast %c255_i32 : i32 to vector<8x128xi32>
    %59 = arith.cmpi ne, %4, %58 : vector<8x128xi32>
    %60 = math.log %52 : vector<8x128xf32>
    %61 = arith.addf %15, %60 : vector<8x128xf32>
    %62 = arith.subf %61, %57 : vector<8x128xf32>
    %cst_38 = arith.constant 0.000000e+00 : f32
    %63 = vector.broadcast %cst_38 : f32 to vector<8x128xf32>
    %64 = arith.select %59, %62, %63 : vector<8x128xi1>, vector<8x128xf32>
    %65 = arith.extui %59 : vector<8x128xi1> to vector<8x128xi32>
    %66 = arith.sitofp %65 : vector<8x128xi32> to vector<8x128xf32>
    %c0_39 = arith.constant 0 : index
    %c0_40 = arith.constant 0 : index
    %c0_41 = arith.constant 0 : index
    %67 = vector.load %arg4[%c0_39, %c0_40, %c0_41] : memref<1x8x128xf32, #tpu.memory_space<vmem>>, vector<1x8x128xf32>
    %68 = vector.shape_cast %67 : vector<1x8x128xf32> to vector<8x128xf32>
    %69 = vector.shape_cast %64 : vector<8x128xf32> to vector<1x8x128xf32>
    %cst_42 = arith.constant dense<0.000000e+00> : vector<8x128xf32>
    %70 = vector.multi_reduction <add>, %69, %cst_42 [0] : vector<1x8x128xf32> to vector<8x128xf32>
    %71 = arith.addf %68, %70 : vector<8x128xf32>
    %c0_43 = arith.constant 0 : index
    %c0_44 = arith.constant 0 : index
    %c0_45 = arith.constant 0 : index
    %72 = vector.load %arg4[%c0_43, %c0_44, %c0_45] : memref<1x8x128xf32, #tpu.memory_space<vmem>>, vector<1x8x128xf32>
    %73 = vector.shape_cast %72 : vector<1x8x128xf32> to vector<8x128xf32>
    %74 = vector.shape_cast %71 : vector<8x128xf32> to vector<1x8x128xf32>
    tpu.vector_store %arg4[%c0_43, %c0_44, %c0_45], %74 {strides = array<i32>} : memref<1x8x128xf32, #tpu.memory_space<vmem>>, vector<1x8x128xf32>,
    %c0_46 = arith.constant 0 : index
    %c0_47 = arith.constant 0 : index
    %c0_48 = arith.constant 0 : index
    %75 = vector.load %arg5[%c0_46, %c0_47, %c0_48] : memref<1x8x128xf32, #tpu.memory_space<vmem>>, vector<1x8x128xf32>
    %76 = vector.shape_cast %75 : vector<1x8x128xf32> to vector<8x128xf32>
    %77 = vector.shape_cast %66 : vector<8x128xf32> to vector<1x8x128xf32>
    %cst_49 = arith.constant dense<0.000000e+00> : vector<8x128xf32>
    %78 = vector.multi_reduction <add>, %77, %cst_49 [0] : vector<1x8x128xf32> to vector<8x128xf32>
    %79 = arith.addf %76, %78 : vector<8x128xf32>
    %c0_50 = arith.constant 0 : index
    %c0_51 = arith.constant 0 : index
    %c0_52 = arith.constant 0 : index
    %80 = vector.load %arg5[%c0_50, %c0_51, %c0_52] : memref<1x8x128xf32, #tpu.memory_space<vmem>>, vector<1x8x128xf32>
    %81 = vector.shape_cast %80 : vector<1x8x128xf32> to vector<8x128xf32>
    %82 = vector.shape_cast %79 : vector<8x128xf32> to vector<1x8x128xf32>
    tpu.vector_store %arg5[%c0_50, %c0_51, %c0_52], %82 {strides = array<i32>} : memref<1x8x128xf32, #tpu.memory_space<vmem>>, vector<1x8x128xf32>,
    return
  }
  func.func @transform_0(%arg0: i32, %arg1: i32) -> (i32, i32, i32, i32) {
    %c0_i32 = arith.constant 0 : i32
    %c0_i32_0 = arith.constant 0 : i32
    %c0_i32_1 = arith.constant 0 : i32
    return %arg0, %c0_i32, %arg1, %c0_i32_0 : i32, i32, i32, i32
  }
  func.func @transform_1(%arg0: i32, %arg1: i32) -> (i32, i32, i32) {
    %c0_i32 = arith.constant 0 : i32
    %c0_i32_0 = arith.constant 0 : i32
    return %arg0, %arg1, %c0_i32 : i32, i32, i32
  }
  func.func @transform_2(%arg0: i32, %arg1: i32) -> (i32, i32, i32) {
    %c0_i32 = arith.constant 0 : i32
    %c0_i32_0 = arith.constant 0 : i32
    %c0_i32_1 = arith.constant 0 : i32
    return %arg0, %c0_i32, %c0_i32_0 : i32, i32, i32
  }
  func.func @transform_3(%arg0: i32, %arg1: i32) -> (i32, i32, i32) {
    %c0_i32 = arith.constant 0 : i32
    %c0_i32_0 = arith.constant 0 : i32
    %c0_i32_1 = arith.constant 0 : i32
    return %arg0, %c0_i32, %c0_i32_0 : i32, i32, i32
  }
}

</mosaic_0001>

<bundles_post_ra>
// kernel: focal_loss.1
= control target key start
LH: loop header
LB: loop body
LE: loop exit
PB: predicated region body
PF: predicated region fallthrough
CT: control target
= control target key end

     0   :  { %s502_s12 = smov 0   ;;  %s504_s13 = smov 0   ;;  %s548_s0 = inlined_call_operand.vmem [shape: f32[2,4,8,128], index: 0, kind: input, shape index: {}]   ;;  %s549_s1 = inlined_call_operand.vmem [shape: s32[2,8,128], index: 1, kind: input, shape index: {}]   ;;  %s550_s2 = inlined_call_operand.vmem [shape: f32[2,8,128], index: 2, kind: output, shape index: {0}]   ;;  %s551_s3 = inlined_call_operand.vmem [shape: f32[2,8,128], index: 3, kind: output, shape index: {1}]  }
   0x1   :  { %s506_s14 = smov 0  }
   0x2 LB: > { %s26_s15 = sadd.s32 1, %s475_s13  ;;  %p409_p0 = scmp.ge.s32.totalorder %s479_s14, 1  ;;  %s479_s14 = sphi %s506_s14, %s14_s14   ;;  %s475_s13 = sphi %s504_s13, %s553_s13   ;;  %s471_s12 = sphi %s502_s12, %s552_s12  }
   0x3   : > { %p28_p1 = scmp.ge.s32.totalorder %s26_s15, 2  ;;  %p171_p2 = scmp.lt.s32.totalorder %s479_s14, 3 }
   0x5   : > { %s555_s15 = smov (%p28_p1, %s26_s15), 0  ;;  %p172_p3 = pnand %p409_p0, %p171_p2 }
   0x6   : > { %p208_p4 = scmp.lt.s32.totalorder (!%p172_p3), %s471_s12, 1 }
   0x7   : > { %175 = sbr.rel (%p172_p3) target bundleno = 69 (0x45), region = 28 }
   0xc   : > { %s557_s12 = smov (!%p208_p4, %s471_s12), 1  ;;  %v481_v7 = vmov 0.0  }
   0xd   : > { %s421_s16 = sshll.u32 %s557_s12, 5  ;;  %s520_s17 = sshll.u32 %s557_s12, 3 }
   0xe   : > { %s215_s20 = scalar_lea.vmem %s548_s0, %s421_s16  ;;  %s222_s23 = scalar_lea.vmem %s549_s1, %s520_s17 }
   0xf   : > { %v238_v0 = vld [vmem:[%s215_s20] sm:$0xff]  ;;  %v415_v1 = vld [vmem:[%s215_s20 + $0x8] sm:$0xff]  ;;  %v416_v4 = vld [vmem:[%s215_s20 + $0x10] sm:$0xff]  ;;  %s230_s26 = scalar_lea.vmem %s551_s3, %s520_s17  ;;  %s226_s29 = scalar_lea.vmem %s550_s2, %s520_s17 }
  0x10   : > { %v237_v2 = vld [vmem:[%s222_s23] sm:$0xff]  ;;  %v241_v3 = vmax.f32 %v238_v0, %v415_v1  ;;  %v417_v5 = vld [vmem:[%s215_s20 + $0x18] sm:$0xff] }
  0x11   : > { %vm276_vm0 = vcmp.ne.s32.totalorder %v237_v2, 255  ;;  %vm252_vm1 = vcmp.eq.s32.totalorder %v237_v2, 0  ;;  %vm259_vm2 = vcmp.eq.s32.totalorder %v237_v2, 1  ;;  %vm266_vm3 = vcmp.eq.s32.totalorder %v237_v2, 2 }
  0x12   : > { %v244_v6 = vmax.f32 %v241_v3, %v416_v4  ;;  %v418_v8 = vsel %vm276_vm0, 1.0, %v481_v7  ;;  %v253_v25 = vsel %vm252_vm1, %v238_v0, 0.0  ;;  %v260_v26 = vsel %vm259_vm2, %v415_v1, 0.0 }
  0x13   : > { %291 = vst [vmem:[%s230_s26] sm:$0xff] %v418_v8  ;;  %v261_v27 = vadd.f32 %v260_v26, %v253_v25  ;;  %v267_v28 = vsel %vm266_vm3, %v416_v4, 0.0  ;;  %vm273_vm4 = vcmp.eq.s32.totalorder %v237_v2, 3 }
  0x14   : > { %v247_v9 = vmax.f32 %v244_v6, %v417_v5  ;;  %v274_v30 = vsel %vm273_vm4, %v417_v5, 0.0 }
  0x15   : > { %v268_v29 = vadd.f32 %v267_v28, %v261_v27 }
  0x16   : > { %v248_v10 = vsub.f32 %v238_v0, %v247_v9  ;;  %v255_v11 = vsub.f32 %v415_v1, %v247_v9  ;;  %v262_v12 = vsub.f32 %v416_v4, %v247_v9  ;;  %v269_v13 = vsub.f32 %v417_v5, %v247_v9 }
  0x17   : > { %v275_v32 = vadd.f32 %v274_v30, %v268_v29 }
  0x18   : > { %v249_v14 = vmul.f32 1.442695, %v248_v10  ;;  %v256_v15 = vmul.f32 1.442695, %v255_v11  ;;  %v263_v16 = vmul.f32 1.442695, %v262_v12 }
  0x19   : > { %v270_v17 = vmul.f32 1.442695, %v269_v13 }
  0x1a   : > { %447 = vpow2.f32 %v249_v14 }
  0x1b   : > { %449 = vpow2.f32 %v256_v15 }
  0x1c   : > { %451 = vpow2.f32 %v263_v16 }
  0x1d   : > { %453 = vpow2.f32 %v270_v17 }
  0x27   : > { %v448_v18 = vpop.eup %447 }
  0x28   : > { %v450_v19 = vpop.eup %449 }
  0x29   : > { %v452_v20 = vpop.eup %451  ;;  %v258_v21 = vadd.f32 %v450_v19, %v448_v18 }
  0x2a   : > { %v454_v22 = vpop.eup %453 }
  0x2b   : > { %v265_v23 = vadd.f32 %v452_v20, %v258_v21 }
  0x2d   : > { %v272_v24 = vadd.f32 %v454_v22, %v265_v23 }
  0x2f   : > { %455 = vlog2.f32 %v272_v24 }
  0x3c   : > { %v456_v31 = vpop.eup %455 }
  0x3d   : > { %v278_v33 = vmul.f32 0.6931472, %v456_v31 }
  0x3f   : > { %v279_v34 = vadd.f32 %v278_v33, %v247_v9 }
  0x41   : > { %v280_v35 = vsub.f32 %v279_v34, %v275_v32 }
  0x43   : > { %v281_v36 = vsel %vm276_vm0, %v280_v35, 0.0 }
  0x44   : > { %287 = vst [vmem:[%s226_s29] sm:$0xff] %v281_v36 }
  0x45 PF: > { %s14_s14 = sadd.s32 1, %s479_s14   ;;  %s552_s12 = smov %s475_s13 }
  0x46   : > { %p11_p5 = scmp.ge.s32.totalorder %s14_s14, 4   ;;  %s553_s13 = smov %s555_s15 }
  0x48   :  { %13 = sbr.rel (!%p11_p5) target bundleno = 2 (0x2), region = 80 }

</bundles_post_ra>
